<compile_context>
chip_gen: v5e
topology: v5e:2x2
jax: 0.10.0
libtpu: 0.0.40
codegen_flags: <defaults>
</compile_context>

<pallas_src>
import functools
import math

import jax
import jax.numpy as jnp
from jax.experimental import pallas as pl
from jax.experimental.pallas import tpu as pltpu

HIDDEN = 12  # fixed by the PyTorch module


def genre_ae_kernel(x_ref,                 # (input_dim, TILE_B)
                    w1_ref, b1_ref,        # (12, input_dim), (12, 1)
                    w2_ref, b2_ref,        # (latent, 12),    (latent, 1)
                    w3_ref, b3_ref,        # (12, latent),    (12, 1)
                    w4_ref, b4_ref,        # (input_dim, 12), (input_dim, 1)
                    comp_ref, rec_ref,     # (latent, TILE_B), (input_dim, TILE_B)
                    *, matmul_dtype):
    def mm(w_ref, h):
        w = w_ref[...]
        if matmul_dtype is not None:
            w = w.astype(matmul_dtype)
            h = h.astype(matmul_dtype)
        # Feature-major: (out, in) @ (in, TILE_B) -> (out, TILE_B); lane dim = TILE_B.
        return jnp.dot(w, h, preferred_element_type=jnp.float32)

    x = x_ref[...]

    # Encoder: Linear -> ReLU -> Linear -> ReLU  (bias add / ReLU in f32 on the VPU)
    h1 = jnp.maximum(mm(w1_ref, x) + b1_ref[...], 0.0)
    z = jnp.maximum(mm(w2_ref, h1) + b2_ref[...], 0.0)

    # Decoder: Linear -> ReLU -> Linear -> Sigmoid
    h2 = jnp.maximum(mm(w3_ref, z) + b3_ref[...], 0.0)
    logits = mm(w4_ref, h2) + b4_ref[...]
    # exp -> EUP, approx reciprocal -> EUP; keeps VALU slots free on the biggest tensor.
    rec = pl.reciprocal(1.0 + jnp.exp(-logits), approx=True)

    comp_ref[...] = z.astype(comp_ref.dtype)
    rec_ref[...] = rec.astype(rec_ref.dtype)


def genre_ae_forward(x, params, *, tile_b=2048, matmul_dtype=None):
    """x: (B, input_dim) float32.

    Returns (compressed (B, 1, latent_dim), reconstructed (B, 1, input_dim)).
    Set matmul_dtype=jnp.bfloat16 on v6e/v7x for higher MXU throughput (accumulation and
    all elementwise math remain f32).
    """
    B, input_dim = x.shape
    latent_dim = params["w2"].shape[0]

    # Batch tile: multiple of 128 (lane width); don't over-pad tiny batches, cap for VMEM.
    lane = 128
    tile_b = max(lane, min(int(tile_b), pl.cdiv(B, lane) * lane))
    tile_b = pl.cdiv(tile_b, lane) * lane
    b_pad = pl.cdiv(B, tile_b) * tile_b
    num_tiles = b_pad // tile_b

    # Feature-major layout + pad batch to a multiple of the tile (padded cols sliced off).
    x_t = jnp.pad(x.T, ((0, 0), (0, b_pad - B)))

    def full_spec(arr):
        # Weights/biases: one full-array block, resident across all grid steps.
        return pl.BlockSpec(arr.shape, lambda i: (0, 0))

    in_specs = [
        pl.BlockSpec((input_dim, tile_b), lambda i: (0, i)),
        full_spec(params["w1"]), full_spec(params["b1"]),
        full_spec(params["w2"]), full_spec(params["b2"]),
        full_spec(params["w3"]), full_spec(params["b3"]),
        full_spec(params["w4"]), full_spec(params["b4"]),
    ]
    out_specs = (
        pl.BlockSpec((latent_dim, tile_b), lambda i: (0, i)),
        pl.BlockSpec((input_dim, tile_b), lambda i: (0, i)),
    )

    # Advisory cost estimate for XLA's scheduler.
    n_weights = sum(int(p.size) for p in params.values())
    flops = 2 * b_pad * (input_dim * HIDDEN + HIDDEN * latent_dim
                         + latent_dim * HIDDEN + HIDDEN * input_dim)
    cost = pl.CostEstimate(
        flops=int(flops),
        transcendentals=int(b_pad * input_dim),  # exp in sigmoid
        bytes_accessed=int(4 * (b_pad * (2 * input_dim + latent_dim) + n_weights)),
    )

    # VMEM budget: 2 pipeline buffers x (x + comp + rec tiles) + in-kernel intermediates
    # + weights, with margin. Clamp to <=32 MiB so it is safe on v5e/v6e/v7x scoped limits.
    tile_bytes = 4 * tile_b * (2 * input_dim + latent_dim)
    interm_bytes = 4 * tile_b * (2 * HIDDEN + latent_dim + input_dim)
    vmem_need = 2 * tile_bytes + 2 * interm_bytes + 4 * n_weights + (1 << 20)
    vmem_limit = int(min(max(vmem_need, 4 << 20), 32 << 20))

    comp_t, rec_t = pl.pallas_call(
        functools.partial(genre_ae_kernel, matmul_dtype=matmul_dtype),
        out_shape=(
            jax.ShapeDtypeStruct((latent_dim, b_pad), jnp.float32),
            jax.ShapeDtypeStruct((input_dim, b_pad), jnp.float32),
        ),
        grid=(num_tiles,),
        in_specs=in_specs,
        out_specs=out_specs,
        compiler_params=pltpu.CompilerParams(
            dimension_semantics=("parallel",),
            vmem_limit_bytes=vmem_limit,
        ),
        cost_estimate=cost,
    )(
        x_t,
        params["w1"], params["b1"],
        params["w2"], params["b2"],
        params["w3"], params["b3"],
        params["w4"], params["b4"],
    )

    # Back to batch-major, drop padding, re-insert the unsqueeze(1) axis.
    compressed = comp_t[:, :B].T[:, None, :]
    reconstructed = rec_t[:, :B].T[:, None, :]
    return compressed, reconstructed


def init_params(key, input_dim, latent_dim):
    """PyTorch nn.Linear-style init: U(-1/sqrt(fan_in), 1/sqrt(fan_in)).
    Weights stored PyTorch-style (fan_out, fan_in); biases as (fan_out, 1) column vectors
    so they broadcast directly in the feature-major kernel."""
    def linear(k, fan_in, fan_out):
        kw, kb = jax.random.split(k)
        bound = 1.0 / math.sqrt(fan_in)
        w = jax.random.uniform(kw, (fan_out, fan_in), jnp.float32, -bound, bound)
        b = jax.random.uniform(kb, (fan_out, 1), jnp.float32, -bound, bound)
        return w, b

    k1, k2, k3, k4 = jax.random.split(key, 4)
    w1, b1 = linear(k1, input_dim, HIDDEN)
    w2, b2 = linear(k2, HIDDEN, latent_dim)
    w3, b3 = linear(k3, latent_dim, HIDDEN)
    w4, b4 = linear(k4, HIDDEN, input_dim)
    return {"w1": w1, "b1": b1, "w2": w2, "b2": b2,
            "w3": w3, "b3": b3, "w4": w4, "b4": b4}


def reference_forward(x, params):
    """Plain-JAX reference of the PyTorch forward (batch-major) for a sanity check."""
    def lin(h, w, b):
        return h @ w.T + b.reshape(1, -1)

    h1 = jnp.maximum(lin(x, params["w1"], params["b1"]), 0.0)
    z = jnp.maximum(lin(h1, params["w2"], params["b2"]), 0.0)
    h2 = jnp.maximum(lin(z, params["w3"], params["b3"]), 0.0)
    rec = jax.nn.sigmoid(lin(h2, params["w4"], params["b4"]))
    return z[:, None, :], rec[:, None, :]


if __name__ == "__main__":
    B, input_dim, latent_dim = 2, 16, 8
    # NOTE: at B=2 the kernel is a single grid step dominated by launch/DMA latency; the
    # tiling/layout work above only pays off at batch sizes in the thousands.

    key = jax.random.PRNGKey(0)
    k_params, k_x = jax.random.split(key)
    params = init_params(k_params, input_dim, latent_dim)
    x = jax.random.uniform(k_x, (B, input_dim), jnp.float32)  # sigmoid recon -> inputs in [0,1]

    comp, rec = genre_ae_forward(x, params)
    comp = jax.block_until_ready(comp)
    rec = jax.block_until_ready(rec)

    assert comp.shape == (B, 1, latent_dim), comp.shape
    assert rec.shape == (B, 1, input_dim), rec.shape

    comp_ref, rec_ref = reference_forward(x, params)
    assert jnp.allclose(comp, comp_ref, atol=1e-5), "compressed mismatch"
    # approx-EUP reciprocal in the sigmoid: relative error ~2^-12, well within 2e-3.
    assert jnp.allclose(rec, rec_ref, atol=2e-3), "reconstructed mismatch"

    print("KERNEL_OK")
</pallas_src>

<mosaic_0001>
module attributes {stable_mosaic.version = 11 : i64} {
  func.func @genre_ae_kernel(%arg0: i32, %arg1: memref<16x128xf32, #tpu.memory_space<vmem>>, %arg2: memref<12x16xf32, #tpu.memory_space<vmem>>, %arg3: memref<12x1xf32, #tpu.memory_space<vmem>>, %arg4: memref<8x12xf32, #tpu.memory_space<vmem>>, %arg5: memref<8x1xf32, #tpu.memory_space<vmem>>, %arg6: memref<12x8xf32, #tpu.memory_space<vmem>>, %arg7: memref<12x1xf32, #tpu.memory_space<vmem>>, %arg8: memref<16x12xf32, #tpu.memory_space<vmem>>, %arg9: memref<16x1xf32, #tpu.memory_space<vmem>>, %arg10: memref<8x128xf32, #tpu.memory_space<vmem>>, %arg11: memref<16x128xf32, #tpu.memory_space<vmem>>) attributes {dimension_semantics = [#tpu.dimension_semantics<parallel>], iteration_bounds = array<i64: 1>, scalar_prefetch = 0 : i64, scratch_operands = 0 : i64, tpu.core_type = #tpu.core_type<tc>, window_params = [{transform_indices = @transform_0, window_bounds = array<i64: 16, 128>}, {pipeline_mode = #tpu.pipeline_mode<synchronous>, transform_indices = @transform_1, window_bounds = array<i64: 12, 16>}, {pipeline_mode = #tpu.pipeline_mode<synchronous>, transform_indices = @transform_2, window_bounds = array<i64: 12, 1>}, {pipeline_mode = #tpu.pipeline_mode<synchronous>, transform_indices = @transform_3, window_bounds = array<i64: 8, 12>}, {pipeline_mode = #tpu.pipeline_mode<synchronous>, transform_indices = @transform_4, window_bounds = array<i64: 8, 1>}, {pipeline_mode = #tpu.pipeline_mode<synchronous>, transform_indices = @transform_5, window_bounds = array<i64: 12, 8>}, {pipeline_mode = #tpu.pipeline_mode<synchronous>, transform_indices = @transform_6, window_bounds = array<i64: 12, 1>}, {pipeline_mode = #tpu.pipeline_mode<synchronous>, transform_indices = @transform_7, window_bounds = array<i64: 16, 12>}, {pipeline_mode = #tpu.pipeline_mode<synchronous>, transform_indices = @transform_8, window_bounds = array<i64: 16, 1>}, {transform_indices = @transform_9, window_bounds = array<i64: 8, 128>}, {transform_indices = @transform_10, window_bounds = array<i64: 16, 128>}]} {
    %c0 = arith.constant 0 : index
    %c0_0 = arith.constant 0 : index
    %0 = vector.load %arg1[%c0, %c0_0] : memref<16x128xf32, #tpu.memory_space<vmem>>, vector<16x128xf32>
    %c0_1 = arith.constant 0 : index
    %c0_2 = arith.constant 0 : index
    %1 = vector.load %arg2[%c0_1, %c0_2] : memref<12x16xf32, #tpu.memory_space<vmem>>, vector<12x16xf32>
    %cst = arith.constant dense<0.000000e+00> : vector<12x128xf32>
    %2 = tpu.matmul %1, %0, %cst {dimension_numbers = #tpu.dot_dimension_numbers<[1], [0], [0], [1], [0, 0, 1, 1], [], []>} : vector<12x16xf32>, vector<16x128xf32>, vector<12x128xf32> -> vector<12x128xf32>
    %c0_3 = arith.constant 0 : index
    %c0_4 = arith.constant 0 : index
    %3 = vector.load %arg3[%c0_3, %c0_4] : memref<12x1xf32, #tpu.memory_space<vmem>>, vector<12x1xf32>
    %4 = vector.broadcast %3 : vector<12x1xf32> to vector<12x128xf32>
    %5 = arith.addf %2, %4 : vector<12x128xf32>
    %cst_5 = arith.constant 0.000000e+00 : f32
    %6 = vector.broadcast %cst_5 : f32 to vector<12x128xf32>
    %7 = arith.maximumf %5, %6 : vector<12x128xf32>
    %c0_6 = arith.constant 0 : index
    %c0_7 = arith.constant 0 : index
    %8 = vector.load %arg4[%c0_6, %c0_7] : memref<8x12xf32, #tpu.memory_space<vmem>>, vector<8x12xf32>
    %cst_8 = arith.constant dense<0.000000e+00> : vector<8x128xf32>
    %9 = tpu.matmul %8, %7, %cst_8 {dimension_numbers = #tpu.dot_dimension_numbers<[1], [0], [0], [1], [0, 0, 1, 1], [], []>} : vector<8x12xf32>, vector<12x128xf32>, vector<8x128xf32> -> vector<8x128xf32>
    %c0_9 = arith.constant 0 : index
    %c0_10 = arith.constant 0 : index
    %10 = vector.load %arg5[%c0_9, %c0_10] : memref<8x1xf32, #tpu.memory_space<vmem>>, vector<8x1xf32>
    %11 = vector.broadcast %10 : vector<8x1xf32> to vector<8x128xf32>
    %12 = arith.addf %9, %11 : vector<8x128xf32>
    %cst_11 = arith.constant 0.000000e+00 : f32
    %13 = vector.broadcast %cst_11 : f32 to vector<8x128xf32>
    %14 = arith.maximumf %12, %13 : vector<8x128xf32>
    %c0_12 = arith.constant 0 : index
    %c0_13 = arith.constant 0 : index
    %15 = vector.load %arg6[%c0_12, %c0_13] : memref<12x8xf32, #tpu.memory_space<vmem>>, vector<12x8xf32>
    %cst_14 = arith.constant dense<0.000000e+00> : vector<12x128xf32>
    %16 = tpu.matmul %15, %14, %cst_14 {dimension_numbers = #tpu.dot_dimension_numbers<[1], [0], [0], [1], [0, 0, 1, 1], [], []>} : vector<12x8xf32>, vector<8x128xf32>, vector<12x128xf32> -> vector<12x128xf32>
    %c0_15 = arith.constant 0 : index
    %c0_16 = arith.constant 0 : index
    %17 = vector.load %arg7[%c0_15, %c0_16] : memref<12x1xf32, #tpu.memory_space<vmem>>, vector<12x1xf32>
    %18 = vector.broadcast %17 : vector<12x1xf32> to vector<12x128xf32>
    %19 = arith.addf %16, %18 : vector<12x128xf32>
    %cst_17 = arith.constant 0.000000e+00 : f32
    %20 = vector.broadcast %cst_17 : f32 to vector<12x128xf32>
    %21 = arith.maximumf %19, %20 : vector<12x128xf32>
    %c0_18 = arith.constant 0 : index
    %c0_19 = arith.constant 0 : index
    %22 = vector.load %arg8[%c0_18, %c0_19] : memref<16x12xf32, #tpu.memory_space<vmem>>, vector<16x12xf32>
    %cst_20 = arith.constant dense<0.000000e+00> : vector<16x128xf32>
    %23 = tpu.matmul %22, %21, %cst_20 {dimension_numbers = #tpu.dot_dimension_numbers<[1], [0], [0], [1], [0, 0, 1, 1], [], []>} : vector<16x12xf32>, vector<12x128xf32>, vector<16x128xf32> -> vector<16x128xf32>
    %c0_21 = arith.constant 0 : index
    %c0_22 = arith.constant 0 : index
    %24 = vector.load %arg9[%c0_21, %c0_22] : memref<16x1xf32, #tpu.memory_space<vmem>>, vector<16x1xf32>
    %25 = vector.broadcast %24 : vector<16x1xf32> to vector<16x128xf32>
    %26 = arith.addf %23, %25 : vector<16x128xf32>
    %cst_23 = arith.constant 0.000000e+00 : f32
    %27 = vector.broadcast %cst_23 : f32 to vector<16x128xf32>
    %28 = arith.subf %27, %26 : vector<16x128xf32>
    %29 = math.exp %28 : vector<16x128xf32>
    %cst_24 = arith.constant 1.000000e+00 : f32
    %30 = vector.broadcast %cst_24 : f32 to vector<16x128xf32>
    %31 = arith.addf %30, %29 : vector<16x128xf32>
    %32 = tpu.reciprocal %31 {approx = true} : vector<16x128xf32> -> vector<16x128xf32>
    %c0_25 = arith.constant 0 : index
    %c0_26 = arith.constant 0 : index
    %33 = vector.load %arg10[%c0_25, %c0_26] : memref<8x128xf32, #tpu.memory_space<vmem>>, vector<8x128xf32>
    tpu.vector_store %arg10[%c0_25, %c0_26], %14 {strides = array<i32>} : memref<8x128xf32, #tpu.memory_space<vmem>>, vector<8x128xf32>,
    %c0_27 = arith.constant 0 : index
    %c0_28 = arith.constant 0 : index
    %34 = vector.load %arg11[%c0_27, %c0_28] : memref<16x128xf32, #tpu.memory_space<vmem>>, vector<16x128xf32>
    tpu.vector_store %arg11[%c0_27, %c0_28], %32 {strides = array<i32>} : memref<16x128xf32, #tpu.memory_space<vmem>>, vector<16x128xf32>,
    return
  }
  func.func @transform_0(%arg0: i32) -> (i32, i32) {
    %c0_i32 = arith.constant 0 : i32
    %c0_i32_0 = arith.constant 0 : i32
    return %c0_i32, %arg0 : i32, i32
  }
  func.func @transform_1(%arg0: i32) -> (i32, i32) {
    %c0_i32 = arith.constant 0 : i32
    %c0_i32_0 = arith.constant 0 : i32
    %c0_i32_1 = arith.constant 0 : i32
    return %c0_i32, %c0_i32_0 : i32, i32
  }
  func.func @transform_2(%arg0: i32) -> (i32, i32) {
    %c0_i32 = arith.constant 0 : i32
    %c0_i32_0 = arith.constant 0 : i32
    %c0_i32_1 = arith.constant 0 : i32
    return %c0_i32, %c0_i32_0 : i32, i32
  }
  func.func @transform_3(%arg0: i32) -> (i32, i32) {
    %c0_i32 = arith.constant 0 : i32
    %c0_i32_0 = arith.constant 0 : i32
    %c0_i32_1 = arith.constant 0 : i32
    return %c0_i32, %c0_i32_0 : i32, i32
  }
  func.func @transform_4(%arg0: i32) -> (i32, i32) {
    %c0_i32 = arith.constant 0 : i32
    %c0_i32_0 = arith.constant 0 : i32
    %c0_i32_1 = arith.constant 0 : i32
    return %c0_i32, %c0_i32_0 : i32, i32
  }
  func.func @transform_5(%arg0: i32) -> (i32, i32) {
    %c0_i32 = arith.constant 0 : i32
    %c0_i32_0 = arith.constant 0 : i32
    %c0_i32_1 = arith.constant 0 : i32
    return %c0_i32, %c0_i32_0 : i32, i32
  }
  func.func @transform_6(%arg0: i32) -> (i32, i32) {
    %c0_i32 = arith.constant 0 : i32
    %c0_i32_0 = arith.constant 0 : i32
    %c0_i32_1 = arith.constant 0 : i32
    return %c0_i32, %c0_i32_0 : i32, i32
  }
  func.func @transform_7(%arg0: i32) -> (i32, i32) {
    %c0_i32 = arith.constant 0 : i32
    %c0_i32_0 = arith.constant 0 : i32
    %c0_i32_1 = arith.constant 0 : i32
    return %c0_i32, %c0_i32_0 : i32, i32
  }
  func.func @transform_8(%arg0: i32) -> (i32, i32) {
    %c0_i32 = arith.constant 0 : i32
    %c0_i32_0 = arith.constant 0 : i32
    %c0_i32_1 = arith.constant 0 : i32
    return %c0_i32, %c0_i32_0 : i32, i32
  }
  func.func @transform_9(%arg0: i32) -> (i32, i32) {
    %c0_i32 = arith.constant 0 : i32
    %c0_i32_0 = arith.constant 0 : i32
    return %c0_i32, %arg0 : i32, i32
  }
  func.func @transform_10(%arg0: i32) -> (i32, i32) {
    %c0_i32 = arith.constant 0 : i32
    %c0_i32_0 = arith.constant 0 : i32
    return %c0_i32, %arg0 : i32, i32
  }
}

</mosaic_0001>

<bundles_post_ra>
// kernel: tpu_custom_call.1
= control target key start
LH: loop header
LB: loop body
LE: loop exit
PB: predicated region body
PF: predicated region fallthrough
CT: control target
= control target key end

     0   :  { %16 = vsyncpa [#allocation3], 0  ;;  %v336_v3 = vmov 0   ;;  %vm52_vm0 = vcmask 130048   ;;  %s455_s0 = inlined_call_operand.vmem [shape: f32[16,128], index: 0, kind: input, shape index: {}]   ;;  %s456_s1 = inlined_call_operand.vmem [shape: f32[12,16], index: 1, kind: input, shape index: {}]   ;;  %s457_s2 = inlined_call_operand.vmem [shape: f32[12,1], index: 2, kind: input, shape index: {}]   ;;  %s458_s3 = inlined_call_operand.vmem [shape: f32[8,12], index: 3, kind: input, shape index: {}]   ;;  %s459_s4 = inlined_call_operand.vmem [shape: f32[8,1], index: 4, kind: input, shape index: {}]   ;;  %s460_s5 = inlined_call_operand.vmem [shape: f32[12,8], index: 5, kind: input, shape index: {}]   ;;  %s461_s6 = inlined_call_operand.vmem [shape: f32[12,1], index: 6, kind: input, shape index: {}]   ;;  %s462_s7 = inlined_call_operand.vmem [shape: f32[16,12], index: 7, kind: input, shape index: {}]   ;;  %s463_s8 = inlined_call_operand.vmem [shape: f32[16,1], index: 8, kind: input, shape index: {}]   ;;  %s464_s9 = inlined_call_operand.hbm [shape: f32[8,128], index: 9, kind: output, shape index: {0}]   ;;  %s465_s10 = inlined_call_operand.hbm [shape: f32[16,128], index: 10, kind: output, shape index: {1}]  }
   0x1   :  { %v37_v0 = vld [vmem:[%s455_s0 + $0x8] sm:$0xff]  ;;  %v36_v2 = vld [vmem:[%s455_s0] sm:$0xff]  ;;  %273 = vset.pattern.permute.xlu0 %v336_v3  ;;  %274 = vset.pattern.permute.xlu1 %v336_v3 }
   0x2   :  { %v41_v1 = vld [vmem:[%s457_s2 + $0x8] sm:$0xf]  ;;  %73 = vmatpush.msra.mxu0 %v37_v0  ;;  %v38_v4 = vld [vmem:[%s456_s1] sm:$0xff] }
   0x3   :  { %49 = vperm.xlu0 %273, %v41_v1  }
   0x4   :  { %17 = vsyncpa [#allocation5], 0  ;;  %74 = vmatpush.msra.mxu0 %v36_v2  ;;  %275 = vset.pattern.permute.xlu2 %v336_v3  ;;  %v40_v5 = vld [vmem:[%s457_s2] sm:$0xff]  ;;  %v39_v6 = vld [vmem:[%s456_s1 + $0x8] sm:$0xf]  ;;  %vm95_vm1 = vcmask 1043456  }
   0x5   :  { %259 = vmatmul.msk.f32.vlgmr.msra.gmra.mxu0 %vm52_vm0, %v38_v4  ;;  %v169_v7 = vld [vmem:[%s463_s8 + $0x8] sm:$0xff]  ;;  %v85_v8 = vld [vmem:[%s459_s4] sm:$0xff]  ;;  %vm91_vm2 = vcmask 97280   ;;  %vm134_vm3 = vcmask 64512   ;;  %s337_s17 = smov [#allocation2]   ;;  %s232_s21 = sshll.u32 %s464_s9, 4  ;;  %s233_s21 = int_to_ptr.hbm [resolvable:$true] %s232_s21 }
   0x6   :  { %88 = vperm.xlu1 %274, %v85_v8   ;;  %v123_v9 = vld [vmem:[%s461_s6 + $0x8] sm:$0xf]  ;;  %v84_v18 = vld [vmem:[%s458_s3] sm:$0xff]  ;;  %s230_s18 = sshll.u32 %s337_s17, 4  ;;  %s242_s0 = sshll.u32 %s465_s10, 4  ;;  %s231_s18 = int_to_ptr.vmem [resolvable:$true] %s230_s18  ;;  %s243_s0 = int_to_ptr.hbm [resolvable:$true] %s242_s0 }
   0x7   :  { %v122_v19 = vld [vmem:[%s461_s6] sm:$0xff]  ;;  %v121_v26 = vld [vmem:[%s460_s5 + $0x8] sm:$0xf]  ;;  %s339_s24 = smov 128   ;;  %s340_s25 = smov 8  }
   0x8   :  { %126 = vperm.xlu2 %275, %v122_v19   ;;  %v168_v20 = vld [vmem:[%s463_s8] sm:$0xff]  ;;  %v167_v36 = vld [vmem:[%s462_s7 + $0x8] sm:$0xff] }
   0x9   :  { %v120_v25 = vld [vmem:[%s460_s5] sm:$0xff] }
   0xa   :  { %v166_v35 = vld [vmem:[%s462_s7] sm:$0xff]  ;;  %s338_s7 = smov [#allocation4]  }
   0xb   :  { %44 = vperm.xlu0 %273, %v40_v5   ;;  %s240_s9 = sshll.u32 %s338_s7, 4  ;;  %s241_s9 = int_to_ptr.vmem [resolvable:$true] %s240_s9 }
   0xd   :  { %260 = vmatmul.msk.f32.gmra.mxu0 %vm52_vm0, %v39_v6 }
   0xe   :  { %131 = vperm.xlu1 %274, %v123_v9  }
  0x10   :  { %172 = vperm.xlu2 %275, %v168_v20  }
  0x13   :  { %177 = vperm.xlu0 %273, %v169_v7  }
  0x62   :  { %v127_v28 = vpop.permute.xlu2 %126 }
  0x6a   :  { %v173_v37 = vpop.permute.xlu2 %172 }
  0x75   :  { %v50_v10 = vpop.permute.xlu0 %49 }
  0x78   :  { %v89_v21 = vpop.permute.xlu1 %88 }
  0x7d   :  { %v45_v12 = vpop.permute.xlu0 %44 }
  0x80   :  { %v132_v29 = vpop.permute.xlu1 %131 }
  0x82   :  { %v76_v11 = vpop.f32.mrf.mxu0 }
  0x83   :  { %v77_v14 = vadd.f32 %v76_v11, %v45_v12 }
  0x85   :  { %v82_v17 = vmax.f32 %v77_v14, 0.0  ;;  %v178_v42 = vpop.permute.xlu0 %177 }
  0x8a   :  { %v79_v13 = vpop.f32.mrf.mxu0 }
  0x8b   :  { %v80_v15 = vadd.f32 %v79_v13, %v50_v10 }
  0x8d   :  { %v83_v16 = vmax.f32 %v80_v15, 0.0 }
  0x8f   :  { %261 = vmatpush.msk.msra.mxu1 %vm95_vm1, %v83_v16 }
  0x91   :  { %114 = vmatpush.msra.mxu1 %v82_v17 }
  0x92   :  { %262 = vmatmul.msk.f32.vlgmr.msra.gmra.mxu1 %vm91_vm2, %v84_v18 }
 0x10f   :  { %v116_v22 = vpop.f32.mrf.mxu1 }
 0x110   :  { %v117_v23 = vadd.f32 %v116_v22, %v89_v21 }
 0x112   :  { %v119_v24 = vmax.f32 %v117_v23, 0.0 }
 0x114   :  { %222 = vst [vmem:[#allocation2] sm:$0xff] %v119_v24  ;;  %156 = vmatpush.msra.mxu2 %v119_v24 }
 0x115   :  { %263 = vmatmul.msk.f32.vlgmr.msra.gmra.mxu2 %vm134_vm3, %v120_v25  ;;  %235 = dma.vmem_to_hbm [thread:$0]  %s231_s18, 128, %s233_s21, [#allocation3]  }
 0x11d   :  { %264 = vmatmul.msk.f32.gmra.mxu2 %vm134_vm3, %v121_v26 }
 0x198   :  { %v158_v27 = vpop.f32.mrf.mxu2 }
 0x199   :  { %v159_v31 = vadd.f32 %v158_v27, %v127_v28 }
 0x19b   :  { %v164_v34 = vmax.f32 %v159_v31, 0.0 }
 0x1a0   :  { %v161_v30 = vpop.f32.mrf.mxu2 }
 0x1a1   :  { %v162_v32 = vadd.f32 %v161_v30, %v132_v29 }
 0x1a3   :  { %v165_v33 = vmax.f32 %v162_v32, 0.0 }
 0x1a5   :  { %265 = vmatpush.msk.msra.mxu3 %vm95_vm1, %v165_v33 }
 0x1a7   :  { %204 = vmatpush.msra.mxu3 %v164_v34 }
 0x1a8   :  { %266 = vmatmul.msk.f32.vlgmr.msra.gmra.mxu3 %vm91_vm2, %v166_v35 }
 0x1b0   :  { %267 = vmatmul.msk.f32.gmra.mxu3 %vm91_vm2, %v167_v36 }
 0x22b   :  { %v206_v38 = vpop.f32.mrf.mxu3 }
 0x22c   :  { %v207_v39 = vadd.f32 %v206_v38, %v173_v37 }
 0x22e   :  { %v212_v40 = vsub.f32 0.0, %v207_v39 }
 0x230   :  { %v214_v41 = vmul.f32 1.442695, %v212_v40 }
 0x232   :  { %276 = vpow2.f32 %v214_v41 }
 0x233   :  { %v209_v43 = vpop.f32.mrf.mxu3 }
 0x234   :  { %v210_v44 = vadd.f32 %v209_v43, %v178_v42 }
 0x236   :  { %v213_v45 = vsub.f32 0.0, %v210_v44 }
 0x238   :  { %v277_v46 = vpop.eup %276  ;;  %v216_v47 = vmul.f32 1.442695, %v213_v45 }
 0x239   :  { %v218_v48 = vadd.f32 1.0, %v277_v46 }
 0x23a   :  { %278 = vpow2.f32 %v216_v47 }
 0x23b   :  { %280 = vrcp.f32 %v218_v48 }
 0x240   :  { %v279_v49 = vpop.eup %278 }
 0x241   :  { %v281_v50 = vpop.eup %280  ;;  %v219_v51 = vadd.f32 1.0, %v279_v49 }
 0x242   :  { %223 = vst [vmem:[#allocation4] sm:$0xff] %v281_v50 }
 0x243   :  { %282 = vrcp.f32 %v219_v51 }
 0x249   :  { %v283_v52 = vpop.eup %282 }
 0x24a   :  { %224 = vst [vmem:[#allocation4 + $0x8] sm:$0xff] %v283_v52 }
 0x24b   :  { %248 = dma.vmem_to_hbm [thread:$0]  %s241_s9, 256, %s243_s0, [#allocation5], %s339_s24, %s339_s24, %s340_s25  }
 0x24c   :  { %332 = dma.done.wait [#allocation3], 128  }
 0x24d   :  { %333 = vsyncadd [#allocation3], 4294967168 }
 0x24e   :  { %334 = dma.done.wait [#allocation5], 256  }
 0x24f   :  { %335 = vsyncadd [#allocation5], 4294967040 }
 0x250   :  { %257 = vsyncpa [#allocation3], 1 }
 0x251   :  { %258 = vsyncpa [#allocation5], 1 }

</bundles_post_ra>
